<compile_context>
chip_gen: v7x
topology: tpu7x:2x2x1
jax: 0.10.0
libtpu: 0.0.40
codegen_flags: <defaults>
</compile_context>

<pallas_src>
import jax
import jax.numpy as jnp
from jax.experimental import pallas as pl
from jax.experimental.pallas import tpu as pltpu

_LANE = 128
_SUBLANE = 8


def _round_up(n, m):
    return ((n + m - 1) // m) * m


def _pad_2d(a, rows, cols):
    r, c = a.shape
    return jnp.pad(a, ((0, rows - r), (0, cols - c)))


def _make_ffnn_kernel(num_linear, compute_dtype):
    """Fused kernel: num_linear Linear layers, ReLU between all but the last.

    refs = (x, W0, b0, W1, b1, ..., out).  Weights arrive already in compute_dtype,
    biases in f32.  Matmuls accumulate in f32 on the MXU; elementwise ops stay f32.
    """

    def kernel(*refs):
        x_ref = refs[0]
        o_ref = refs[-1]
        h = x_ref[...]  # f32 [B_pad, D_pad]
        for i in range(num_linear):
            w_ref = refs[1 + 2 * i]
            b_ref = refs[2 + 2 * i]
            acc = jnp.dot(
                h.astype(compute_dtype),
                w_ref[...],
                preferred_element_type=jnp.float32,
            )
            h = acc + b_ref[...]  # bias add in f32
            if i < num_linear - 1:
                h = jnp.maximum(h, 0.0)  # ReLU in f32
                # Dropout(0.3): identity in eval mode.
        o_ref[...] = h.astype(o_ref.dtype)

    return kernel


def ffnn_forward(x, params, *, compute_dtype=jnp.bfloat16):
    """Run the full FFNN forward in a single fused, single-grid-step Pallas kernel.

    x:      [B, input_dim] float32
    params: list of (W, b) with W shape (in_dim, out_dim), b shape (1, out_dim)
            (PyTorch Linear weights pre-transposed to (in_dim, out_dim)).
    """
    B, D = x.shape
    n = len(params)
    out_dim = params[-1][0].shape[1]

    # Lane/sublane-aligned padded sizes.
    B_pad = _round_up(B, _SUBLANE)
    dims = [D] + [w.shape[1] for (w, _) in params]
    dims_pad = [_round_up(d, _LANE) for d in dims]

    # Zero-pad input, weights, biases.  Zero rows/cols contribute nothing, so the
    # result on the original [:B, :out_dim] window is unchanged.
    x_p = _pad_2d(x.astype(jnp.float32), B_pad, dims_pad[0])
    padded_params = []
    for i, (w, b) in enumerate(params):
        w_p = _pad_2d(w.astype(jnp.float32), dims_pad[i], dims_pad[i + 1])
        w_p = w_p.astype(compute_dtype)  # pre-cast: halves weight VMEM when bf16
        b_p = _pad_2d(b.astype(jnp.float32), 1, dims_pad[i + 1])
        padded_params.append((w_p, b_p))

    kernel = _make_ffnn_kernel(n, compute_dtype)

    # Single grid step: everything resident in VMEM, no per-step pipeline overhead.
    in_specs = [pl.BlockSpec((B_pad, dims_pad[0]), lambda i: (0, 0))]
    flat_args = [x_p]
    for (w_p, b_p) in padded_params:
        in_specs.append(pl.BlockSpec(w_p.shape, lambda i: (0, 0)))
        in_specs.append(pl.BlockSpec(b_p.shape, lambda i: (0, 0)))
        flat_args.extend((w_p, b_p))

    out_specs = pl.BlockSpec((B_pad, dims_pad[-1]), lambda i: (0, 0))

    out_padded = pl.pallas_call(
        kernel,
        grid=(1,),
        in_specs=in_specs,
        out_specs=out_specs,
        out_shape=jax.ShapeDtypeStruct((B_pad, dims_pad[-1]), jnp.float32),
        compiler_params=pltpu.CompilerParams(
            dimension_semantics=("arbitrary",),
            vmem_limit_bytes=64 * 1024 * 1024,
        ),
    )(*flat_args)

    # Slice padding (batch rows and lane columns) back off.
    return out_padded[:B, :out_dim]


def init_ffnn_params(key, input_dim, hidden_dim, num_layers, output_dim=5):
    """Deterministic init matching the FFNN layer shapes.

    Returns a list of (W, b) with W already transposed to (in_dim, out_dim).
    """
    dims = [input_dim] + [hidden_dim] * num_layers + [output_dim]
    params = []
    for i in range(len(dims) - 1):
        d_in, d_out = dims[i], dims[i + 1]
        key, kw, kb = jax.random.split(key, 3)
        bound = 1.0 / jnp.sqrt(jnp.float32(d_in))
        w = jax.random.uniform(kw, (d_in, d_out), jnp.float32, -bound, bound)
        b = jax.random.uniform(kb, (1, d_out), jnp.float32, -bound, bound)
        params.append((w, b))
    return params


def ffnn_reference(x, params):
    """Pure-JAX f32 reference (eval-mode forward)."""
    h = x
    n = len(params)
    for i, (w, b) in enumerate(params):
        h = h @ w + b
        if i < n - 1:
            h = jnp.maximum(h, 0.0)
    return h


if __name__ == "__main__":
    # Small shapes consistent with the module: batch=16, input_dim=32,
    # hidden_dim=32, num_layers=2, output_dim=5.
    batch, input_dim, hidden_dim, num_layers, output_dim = 16, 32, 32, 2, 5

    key = jax.random.PRNGKey(0)
    key, kx = jax.random.split(key)
    x = jax.random.normal(kx, (batch, input_dim), jnp.float32)
    params = init_ffnn_params(key, input_dim, hidden_dim, num_layers, output_dim)

    ref = ffnn_reference(x, params)

    # 1) f32-compute path: must match the f32 reference tightly (structural check).
    out_f32 = jax.block_until_ready(ffnn_forward(x, params, compute_dtype=jnp.float32))
    assert out_f32.shape == (batch, output_dim)
    assert jnp.allclose(out_f32, ref, atol=1e-5, rtol=1e-5), "f32 path mismatch vs reference"

    # 2) bf16-operand / f32-accumulate path (the performance default): loose tolerance.
    out_bf16 = jax.block_until_ready(ffnn_forward(x, params, compute_dtype=jnp.bfloat16))
    assert out_bf16.shape == (batch, output_dim)
    assert jnp.allclose(out_bf16, ref, atol=5e-2, rtol=5e-2), "bf16 path mismatch vs reference"

    print("KERNEL_OK")
</pallas_src>

<mosaic_0001>
module attributes {stable_mosaic.version = 11 : i64} {
  func.func @kernel(%arg0: i32, %arg1: memref<16x128xf32, #tpu.memory_space<vmem>>, %arg2: memref<128x128xf32, #tpu.memory_space<vmem>>, %arg3: memref<1x128xf32, #tpu.memory_space<vmem>>, %arg4: memref<128x128xf32, #tpu.memory_space<vmem>>, %arg5: memref<1x128xf32, #tpu.memory_space<vmem>>, %arg6: memref<128x128xf32, #tpu.memory_space<vmem>>, %arg7: memref<1x128xf32, #tpu.memory_space<vmem>>, %arg8: memref<16x128xf32, #tpu.memory_space<vmem>>) attributes {dimension_semantics = [#tpu.dimension_semantics<arbitrary>], iteration_bounds = array<i64: 1>, scalar_prefetch = 0 : i64, scratch_operands = 0 : i64, tpu.core_type = #tpu.core_type<tc>, window_params = [{pipeline_mode = #tpu.pipeline_mode<synchronous>, transform_indices = @transform_0, window_bounds = array<i64: 16, 128>}, {pipeline_mode = #tpu.pipeline_mode<synchronous>, transform_indices = @transform_1, window_bounds = array<i64: 128, 128>}, {pipeline_mode = #tpu.pipeline_mode<synchronous>, transform_indices = @transform_2, window_bounds = array<i64: 1, 128>}, {pipeline_mode = #tpu.pipeline_mode<synchronous>, transform_indices = @transform_3, window_bounds = array<i64: 128, 128>}, {pipeline_mode = #tpu.pipeline_mode<synchronous>, transform_indices = @transform_4, window_bounds = array<i64: 1, 128>}, {pipeline_mode = #tpu.pipeline_mode<synchronous>, transform_indices = @transform_5, window_bounds = array<i64: 128, 128>}, {pipeline_mode = #tpu.pipeline_mode<synchronous>, transform_indices = @transform_6, window_bounds = array<i64: 1, 128>}, {pipeline_mode = #tpu.pipeline_mode<synchronous>, transform_indices = @transform_7, window_bounds = array<i64: 16, 128>}]} {
    %c0 = arith.constant 0 : index
    %c0_0 = arith.constant 0 : index
    %0 = vector.load %arg1[%c0, %c0_0] : memref<16x128xf32, #tpu.memory_space<vmem>>, vector<16x128xf32>
    %c0_1 = arith.constant 0 : index
    %c0_2 = arith.constant 0 : index
    %1 = vector.load %arg2[%c0_1, %c0_2] : memref<128x128xf32, #tpu.memory_space<vmem>>, vector<128x128xf32>
    %cst = arith.constant dense<0.000000e+00> : vector<16x128xf32>
    %2 = tpu.matmul %0, %1, %cst {dimension_numbers = #tpu.dot_dimension_numbers<[1], [0], [0], [1], [0, 0, 1, 1], [], []>} : vector<16x128xf32>, vector<128x128xf32>, vector<16x128xf32> -> vector<16x128xf32>
    %c0_3 = arith.constant 0 : index
    %c0_4 = arith.constant 0 : index
    %3 = vector.load %arg3[%c0_3, %c0_4] : memref<1x128xf32, #tpu.memory_space<vmem>>, vector<1x128xf32>
    %4 = vector.broadcast %3 : vector<1x128xf32> to vector<16x128xf32>
    %5 = arith.addf %2, %4 : vector<16x128xf32>
    %cst_5 = arith.constant 0.000000e+00 : f32
    %6 = vector.broadcast %cst_5 : f32 to vector<16x128xf32>
    %7 = arith.maximumf %5, %6 : vector<16x128xf32>
    %c0_6 = arith.constant 0 : index
    %c0_7 = arith.constant 0 : index
    %8 = vector.load %arg4[%c0_6, %c0_7] : memref<128x128xf32, #tpu.memory_space<vmem>>, vector<128x128xf32>
    %cst_8 = arith.constant dense<0.000000e+00> : vector<16x128xf32>
    %9 = tpu.matmul %7, %8, %cst_8 {dimension_numbers = #tpu.dot_dimension_numbers<[1], [0], [0], [1], [0, 0, 1, 1], [], []>} : vector<16x128xf32>, vector<128x128xf32>, vector<16x128xf32> -> vector<16x128xf32>
    %c0_9 = arith.constant 0 : index
    %c0_10 = arith.constant 0 : index
    %10 = vector.load %arg5[%c0_9, %c0_10] : memref<1x128xf32, #tpu.memory_space<vmem>>, vector<1x128xf32>
    %11 = vector.broadcast %10 : vector<1x128xf32> to vector<16x128xf32>
    %12 = arith.addf %9, %11 : vector<16x128xf32>
    %cst_11 = arith.constant 0.000000e+00 : f32
    %13 = vector.broadcast %cst_11 : f32 to vector<16x128xf32>
    %14 = arith.maximumf %12, %13 : vector<16x128xf32>
    %c0_12 = arith.constant 0 : index
    %c0_13 = arith.constant 0 : index
    %15 = vector.load %arg6[%c0_12, %c0_13] : memref<128x128xf32, #tpu.memory_space<vmem>>, vector<128x128xf32>
    %cst_14 = arith.constant dense<0.000000e+00> : vector<16x128xf32>
    %16 = tpu.matmul %14, %15, %cst_14 {dimension_numbers = #tpu.dot_dimension_numbers<[1], [0], [0], [1], [0, 0, 1, 1], [], []>} : vector<16x128xf32>, vector<128x128xf32>, vector<16x128xf32> -> vector<16x128xf32>
    %c0_15 = arith.constant 0 : index
    %c0_16 = arith.constant 0 : index
    %17 = vector.load %arg7[%c0_15, %c0_16] : memref<1x128xf32, #tpu.memory_space<vmem>>, vector<1x128xf32>
    %18 = vector.broadcast %17 : vector<1x128xf32> to vector<16x128xf32>
    %19 = arith.addf %16, %18 : vector<16x128xf32>
    %c0_17 = arith.constant 0 : index
    %c0_18 = arith.constant 0 : index
    %20 = vector.load %arg8[%c0_17, %c0_18] : memref<16x128xf32, #tpu.memory_space<vmem>>, vector<16x128xf32>
    tpu.vector_store %arg8[%c0_17, %c0_18], %19 {strides = array<i32>} : memref<16x128xf32, #tpu.memory_space<vmem>>, vector<16x128xf32>,
    return
  }
  func.func @transform_0(%arg0: i32) -> (i32, i32) {
    %c0_i32 = arith.constant 0 : i32
    %c0_i32_0 = arith.constant 0 : i32
    %c0_i32_1 = arith.constant 0 : i32
    return %c0_i32, %c0_i32_0 : i32, i32
  }
  func.func @transform_1(%arg0: i32) -> (i32, i32) {
    %c0_i32 = arith.constant 0 : i32
    %c0_i32_0 = arith.constant 0 : i32
    %c0_i32_1 = arith.constant 0 : i32
    return %c0_i32, %c0_i32_0 : i32, i32
  }
  func.func @transform_2(%arg0: i32) -> (i32, i32) {
    %c0_i32 = arith.constant 0 : i32
    %c0_i32_0 = arith.constant 0 : i32
    %c0_i32_1 = arith.constant 0 : i32
    return %c0_i32, %c0_i32_0 : i32, i32
  }
  func.func @transform_3(%arg0: i32) -> (i32, i32) {
    %c0_i32 = arith.constant 0 : i32
    %c0_i32_0 = arith.constant 0 : i32
    %c0_i32_1 = arith.constant 0 : i32
    return %c0_i32, %c0_i32_0 : i32, i32
  }
  func.func @transform_4(%arg0: i32) -> (i32, i32) {
    %c0_i32 = arith.constant 0 : i32
    %c0_i32_0 = arith.constant 0 : i32
    %c0_i32_1 = arith.constant 0 : i32
    return %c0_i32, %c0_i32_0 : i32, i32
  }
  func.func @transform_5(%arg0: i32) -> (i32, i32) {
    %c0_i32 = arith.constant 0 : i32
    %c0_i32_0 = arith.constant 0 : i32
    %c0_i32_1 = arith.constant 0 : i32
    return %c0_i32, %c0_i32_0 : i32, i32
  }
  func.func @transform_6(%arg0: i32) -> (i32, i32) {
    %c0_i32 = arith.constant 0 : i32
    %c0_i32_0 = arith.constant 0 : i32
    %c0_i32_1 = arith.constant 0 : i32
    return %c0_i32, %c0_i32_0 : i32, i32
  }
  func.func @transform_7(%arg0: i32) -> (i32, i32) {
    %c0_i32 = arith.constant 0 : i32
    %c0_i32_0 = arith.constant 0 : i32
    %c0_i32_1 = arith.constant 0 : i32
    return %c0_i32, %c0_i32_0 : i32, i32
  }
}

</mosaic_0001>

<bundles_post_ra>
// kernel: tpu_custom_call.1
= control target key start
LH: loop header
LB: loop body
LE: loop exit
PB: predicated region body
PF: predicated region fallthrough
CT: control target
= control target key end

     0   :  { %12 = vsyncpa [#allocation3], 0  ;;  %s1067_s0 = inlined_call_operand.hbm [shape: f32[16,128], index: 0, kind: input, shape index: {}]   ;;  %s1068_s1 = inlined_call_operand.hbm [shape: f32[128,128], index: 1, kind: input, shape index: {}]   ;;  %s1069_s2 = inlined_call_operand.hbm [shape: f32[1,128], index: 2, kind: input, shape index: {}]   ;;  %s1070_s3 = inlined_call_operand.hbm [shape: f32[128,128], index: 3, kind: input, shape index: {}]   ;;  %s1071_s4 = inlined_call_operand.hbm [shape: f32[1,128], index: 4, kind: input, shape index: {}]   ;;  %s1072_s5 = inlined_call_operand.hbm [shape: f32[128,128], index: 5, kind: input, shape index: {}]   ;;  %s1073_s6 = inlined_call_operand.hbm [shape: f32[1,128], index: 6, kind: input, shape index: {}]   ;;  %s1074_s7 = inlined_call_operand.hbm [shape: f32[16,128], index: 7, kind: output, shape index: {}]  }
   0x1   :  { %13 = vsyncpa [#allocation6], 0 }
   0x2   :  { %14 = vsyncpa [#allocation9], 0 }
   0x3   :  { %15 = vsyncpa [#allocation12], 0 }
   0x4   :  { %16 = vsyncpa [#allocation4], 0  ;;  %s892_s24 = smov [#allocation5]   ;;  %s893_s26 = smov [#allocation8]  }
   0x5   :  { %s34_s25 = sshll.u32 %s892_s24, 4  ;;  %s56_s27 = sshll.u32 %s893_s26, 4  ;;  %s35_s25 = int_to_ptr.vmem [resolvable:$true] %s34_s25  ;;  %s942_s27 = int_to_ptr.vmem [resolvable:$true] %s56_s27 }
   0x6   :  { %s706_s30 = scalar_lea.hbm %s1068_s1, 2048 }
   0x7   :  { %p707_p0 = scmp.ne.s32.totalorder %s1068_s1, %s706_s30  ;;  %p710_p1 = scmp.lt.u32.totalorder %s706_s30, %s1068_s1 }
   0x9   :  { %p712_p2 = pnand %p710_p1, %p707_p0 }
   0xb   :  { %715 = shalt.err (!%p712_p2)
}
   0xc   :  { %s716_s12 = scalar_lea.vmem %s35_s25, 2048  ;;  %p721_p4 = scmp.lt.s32.totalorder %s35_s25, %s35_s25 }
   0xd   :  { %p717_p3 = scmp.ne.s32.totalorder %s35_s25, %s716_s12  ;;  %p722_p5 = scmp.lt.s32.totalorder %s716_s12, %s716_s12 }
   0xf   :  { %p723_p6 = por %p722_p5, %p721_p4 }
  0x11   :  { %p724_p7 = pnand %p723_p6, %p717_p3 }
  0x13   :  { %727 = shalt.err (!%p724_p7)
}
  0x14   :  { %s894_s13 = smov 128   ;;  %s895_s14 = smov 8  }
  0x15   :  { %40 = dma.hbm_to_vmem [thread:$0]  %s1068_s1, 2048, %s35_s25, [#allocation6], %s894_s13, %s894_s13, %s895_s14  }
  0x16   :  { %s728_s19 = scalar_lea.hbm %s1070_s3, 2048 }
  0x17   :  { %p729_p8 = scmp.ne.s32.totalorder %s1070_s3, %s728_s19  ;;  %p732_p9 = scmp.lt.u32.totalorder %s728_s19, %s1070_s3 }
  0x19   :  { %p734_p10 = pnand %p732_p9, %p729_p8 }
  0x1b   :  { %737 = shalt.err (!%p734_p10)
}
  0x1c   :  { %s738_s24 = scalar_lea.vmem %s942_s27, 2048  ;;  %p743_p12 = scmp.lt.s32.totalorder %s942_s27, %s942_s27 }
  0x1d   :  { %p739_p11 = scmp.ne.s32.totalorder %s942_s27, %s738_s24  ;;  %p744_p13 = scmp.lt.s32.totalorder %s738_s24, %s738_s24 }
  0x1f   :  { %p745_p0 = por %p744_p13, %p743_p12 }
  0x21   :  { %p746_p1 = pnand %p745_p0, %p739_p11 }
  0x23   :  { %749 = shalt.err (!%p746_p1)
}
  0x24   :  { %62 = dma.hbm_to_vmem [thread:$0]  %s1070_s3, 2048, %s942_s27, [#allocation9], %s894_s13, %s894_s13, %s895_s14  }
  0x25   :  { %s896_s26 = smov [#allocation11]   ;;  %s897_s29 = smov [#allocation2]  }
  0x26   :  { %s78_s28 = sshll.u32 %s896_s26, 4  ;;  %s22_s30 = sshll.u32 %s897_s29, 4  ;;  %s79_s28 = int_to_ptr.vmem [resolvable:$true] %s78_s28  ;;  %s979_s30 = int_to_ptr.vmem [resolvable:$true] %s22_s30 }
  0x27   :  { %s750_s10 = scalar_lea.hbm %s1072_s5, 2048 }
  0x28   :  { %p751_p2 = scmp.ne.s32.totalorder %s1072_s5, %s750_s10  ;;  %p754_p3 = scmp.lt.u32.totalorder %s750_s10, %s1072_s5 }
  0x2a   :  { %p756_p4 = pnand %p754_p3, %p751_p2 }
  0x2c   :  { %759 = shalt.err (!%p756_p4)
}
  0x2d   :  { %s760_s3 = scalar_lea.vmem %s79_s28, 2048  ;;  %p765_p6 = scmp.lt.s32.totalorder %s79_s28, %s79_s28 }
  0x2e   :  { %p761_p5 = scmp.ne.s32.totalorder %s79_s28, %s760_s3  ;;  %p766_p7 = scmp.lt.s32.totalorder %s760_s3, %s760_s3 }
  0x30   :  { %p767_p8 = por %p766_p7, %p765_p6 }
  0x32   :  { %p768_p9 = pnand %p767_p8, %p761_p5 }
  0x34   :  { %771 = shalt.err (!%p768_p9)
}
  0x35   :  { %84 = dma.hbm_to_vmem [thread:$0]  %s1072_s5, 2048, %s79_s28, [#allocation12], %s894_s13, %s894_s13, %s895_s14  }
  0x36   :  { %s772_s20 = scalar_lea.hbm %s1067_s0, 256 }
  0x37   :  { %p773_p10 = scmp.ne.s32.totalorder %s1067_s0, %s772_s20  ;;  %p776_p11 = scmp.lt.u32.totalorder %s772_s20, %s1067_s0 }
  0x39   :  { %p778_p12 = pnand %p776_p11, %p773_p10 }
  0x3b   :  { %781 = shalt.err (!%p778_p12)
}
  0x3c   :  { %s782_s1 = scalar_lea.vmem %s979_s30, 256  ;;  %p787_p0 = scmp.lt.s32.totalorder %s979_s30, %s979_s30 }
  0x3d   :  { %p783_p13 = scmp.ne.s32.totalorder %s979_s30, %s782_s1  ;;  %p788_p1 = scmp.lt.s32.totalorder %s782_s1, %s782_s1 }
  0x3f   :  { %p789_p2 = por %p788_p1, %p787_p0 }
  0x41   :  { %p790_p3 = pnand %p789_p2, %p783_p13 }
  0x43   :  { %793 = shalt.err (!%p790_p3)
}
  0x44   :  { %28 = dma.hbm_to_vmem [thread:$0]  %s1067_s0, 256, %s979_s30, [#allocation3], %s894_s13, %s894_s13, %s895_s14  }
  0x45   :  { %s898_s26 = smov [#allocation7]   ;;  %s899_s29 = smov [#allocation10]  }
  0x46   :  { %s47_s28 = sshll.u32 %s898_s26, 4  ;;  %s69_s8 = sshll.u32 %s899_s29, 4  ;;  %s48_s28 = int_to_ptr.vmem [resolvable:$true] %s47_s28  ;;  %s70_s8 = int_to_ptr.vmem [resolvable:$true] %s69_s8 }
  0x47   :  { %s794_s11 = scalar_lea.hbm %s1069_s2, 16 }
  0x48   :  { %p795_p4 = scmp.ne.s32.totalorder %s1069_s2, %s794_s11  ;;  %p798_p5 = scmp.lt.u32.totalorder %s794_s11, %s1069_s2 }
  0x4a   :  { %p800_p6 = pnand %p798_p5, %p795_p4 }
  0x4c   :  { %803 = shalt.err (!%p800_p6)
}
  0x4d   :  { %s804_s0 = scalar_lea.vmem %s48_s28, 16  ;;  %s808_s30 = scalar_lea.vmem %s48_s28, 32 }
  0x4e   :  { %p805_p7 = scmp.ne.s32.totalorder %s48_s28, %s804_s0  ;;  %p809_p8 = scmp.lt.s32.totalorder %s48_s28, %s48_s28 }
  0x4f   :  { %p810_p9 = scmp.lt.s32.totalorder %s808_s30, %s804_s0 }
  0x51   :  { %p811_p10 = por %p810_p9, %p809_p8 }
  0x53   :  { %p812_p11 = pnand %p811_p10, %p805_p7 }
  0x55   :  { %815 = shalt.err (!%p812_p11)
}
  0x56   :  { %50 = dma.hbm_to_vmem [thread:$0]  %s1069_s2, 16, %s48_s28, [#allocation6]  }
  0x57   :  { %s816_s20 = scalar_lea.hbm %s1071_s4, 16 }
  0x58   :  { %p817_p12 = scmp.ne.s32.totalorder %s1071_s4, %s816_s20  ;;  %p820_p13 = scmp.lt.u32.totalorder %s816_s20, %s1071_s4 }
  0x5a   :  { %p822_p0 = pnand %p820_p13, %p817_p12 }
  0x5c   :  { %825 = shalt.err (!%p822_p0)
}
  0x5d   :  { %s826_s1 = scalar_lea.vmem %s70_s8, 16  ;;  %s830_s5 = scalar_lea.vmem %s70_s8, 32 }
  0x5e   :  { %p827_p1 = scmp.ne.s32.totalorder %s70_s8, %s826_s1  ;;  %p831_p2 = scmp.lt.s32.totalorder %s70_s8, %s70_s8 }
  0x5f   :  { %p832_p3 = scmp.lt.s32.totalorder %s830_s5, %s826_s1 }
  0x61   :  { %p833_p4 = por %p832_p3, %p831_p2 }
  0x63   :  { %p834_p5 = pnand %p833_p4, %p827_p1 }
  0x65   :  { %837 = shalt.err (!%p834_p5)
}
  0x66   :  { %72 = dma.hbm_to_vmem [thread:$0]  %s1071_s4, 16, %s70_s8, [#allocation9]  }
  0x67   :  { %s900_s26 = smov [#allocation13]   ;;  %s838_s10 = scalar_lea.hbm %s1073_s6, 16 }
  0x68   :  { %s91_s28 = sshll.u32 %s900_s26, 4  ;;  %p839_p6 = scmp.ne.s32.totalorder %s1073_s6, %s838_s10  ;;  %s92_s28 = int_to_ptr.vmem [resolvable:$true] %s91_s28 }
  0x69   :  { %p842_p7 = scmp.lt.u32.totalorder %s838_s10, %s1073_s6 }
  0x6b   :  { %p844_p8 = pnand %p842_p7, %p839_p6 }
  0x6d   :  { %847 = shalt.err (!%p844_p8)
}
  0x6e   :  { %s848_s3 = scalar_lea.vmem %s92_s28, 16  ;;  %s852_s4 = scalar_lea.vmem %s92_s28, 32 }
  0x6f   :  { %p849_p9 = scmp.ne.s32.totalorder %s92_s28, %s848_s3  ;;  %p853_p10 = scmp.lt.s32.totalorder %s92_s28, %s92_s28 }
  0x70   :  { %p854_p11 = scmp.lt.s32.totalorder %s852_s4, %s848_s3 }
  0x72   :  { %p855_p12 = por %p854_p11, %p853_p10 }
  0x74   :  { %p856_p13 = pnand %p855_p12, %p849_p9 }
  0x76   :  { %859 = shalt.err (!%p856_p13)
}
  0x77   :  { %94 = dma.hbm_to_vmem [thread:$0]  %s1073_s6, 16, %s92_s28, [#allocation12]  }
  0x78   :  { %882 = dma.done.wait [#allocation3], 256  }
  0x79   :  { %883 = vsyncadd [#allocation3], 4294967040 }
  0x7a   :  { %884 = dma.done.wait [#allocation6], 2064  }
  0x7b   :  { %885 = vsyncadd [#allocation6], 4294965232 }
  0x7c   :  { %886 = dma.done.wait [#allocation9], 2064  }
  0x7d   :  { %887 = vsyncadd [#allocation9], 4294965232 }
  0x7e   :  { %888 = dma.done.wait [#allocation12], 2064  }
  0x7f   :  { %889 = vsyncadd [#allocation12], 4294965232  ;;  %v118_v0 = vld [vmem:[#allocation5] sm:$0xff]  ;;  %v119_v1 = vld [vmem:[#allocation5 + $0x8] sm:$0xff]  ;;  %s901_s6 = smov [#allocation14]  }
  0x80   :  { %v120_v2 = vld [vmem:[#allocation5 + $0x10] sm:$0xff]  ;;  %v600_v3 = vpack.c.bf16 %v119_v1, %v118_v0  ;;  %v121_v4 = vld [vmem:[#allocation5 + $0x18] sm:$0xff]  ;;  %v122_v6 = vld [vmem:[#allocation5 + $0x20] sm:$0xff]  ;;  %s423_s30 = sshll.u32 %s901_s6, 4  ;;  %s424_s30 = int_to_ptr.vmem [resolvable:$true] %s423_s30 }
  0x81   :  { %v604_v5 = vpack.c.bf16 %v121_v4, %v120_v2  ;;  %v123_v7 = vld [vmem:[#allocation5 + $0x28] sm:$0xff]  ;;  %v124_v9 = vld [vmem:[#allocation5 + $0x30] sm:$0xff]  ;;  %v125_v10 = vld [vmem:[#allocation5 + $0x38] sm:$0xff]  ;;  %s860_s27 = scalar_lea.vmem %s424_s30, 256  ;;  %p865_p1 = scmp.lt.s32.totalorder %s424_s30, %s424_s30 }
  0x82   :  { %601 = vmatprep.subr.bf16.mxu0 %v600_v3  ;;  %v608_v8 = vpack.c.bf16 %v123_v7, %v122_v6  ;;  %v116_v11 = vld [vmem:[#allocation2] sm:$0xff]  ;;  %v218_v12 = vld [vmem:[#allocation8] sm:$0xff]  ;;  %v221_v16 = vld [vmem:[#allocation8 + $0x18] sm:$0xff]  ;;  %v612_v20 = vpack.c.bf16 %v125_v10, %v124_v9  ;;  %p861_p0 = scmp.ne.s32.totalorder %s424_s30, %s860_s27  ;;  %p866_p2 = scmp.lt.s32.totalorder %s860_s27, %s860_s27 }
  0x83   :  { %603 = vmatpush3.bf16.msra.mxu0 %v600_v3  ;;  %527 = vmatprep.mubr.f32.mxu0 %v116_v11  ;;  %v219_v13 = vld [vmem:[#allocation8 + $0x8] sm:$0xff]  ;;  %v220_v14 = vld [vmem:[#allocation8 + $0x10] sm:$0xff]  ;;  %v222_v18 = vld [vmem:[#allocation8 + $0x20] sm:$0xff] }
  0x84   :  { %605 = vmatprep.subr.bf16.mxu0 %v604_v5  ;;  %v632_v15 = vpack.c.bf16 %v219_v13, %v218_v12  ;;  %v636_v17 = vpack.c.bf16 %v221_v16, %v220_v14  ;;  %v223_v19 = vld [vmem:[#allocation8 + $0x28] sm:$0xff]  ;;  %v126_v21 = vld [vmem:[#allocation5 + $0x40] sm:$0xff]  ;;  %v224_v24 = vld [vmem:[#allocation8 + $0x30] sm:$0xff]  ;;  %p867_p3 = por %p866_p2, %p865_p1 }
  0x85   :  { %v127_v22 = vld [vmem:[#allocation5 + $0x48] sm:$0xff]  ;;  %v640_v23 = vpack.c.bf16 %v223_v19, %v222_v18  ;;  %v225_v25 = vld [vmem:[#allocation8 + $0x38] sm:$0xff]  ;;  %v128_v27 = vld [vmem:[#allocation5 + $0x50] sm:$0xff] }
  0x86   :  { %633 = vmatprep.subr.bf16.mxu1 %v632_v15  ;;  %v616_v26 = vpack.c.bf16 %v127_v22, %v126_v21  ;;  %v129_v28 = vld [vmem:[#allocation5 + $0x58] sm:$0xff]  ;;  %v644_v29 = vpack.c.bf16 %v225_v25, %v224_v24  ;;  %v226_v30 = vld [vmem:[#allocation8 + $0x40] sm:$0xff]  ;;  %v227_v31 = vld [vmem:[#allocation8 + $0x48] sm:$0xff]  ;;  %p868_p4 = pnand %p867_p3, %p861_p0 }
  0x87   :  { %607 = vmatpush3.bf16.msra.mxu0 %v604_v5  ;;  %635 = vmatpush3.bf16.msra.mxu1 %v632_v15  ;;  %v620_v32 = vpack.c.bf16 %v129_v28, %v128_v27  ;;  %v130_v33 = vld [vmem:[#allocation5 + $0x60] sm:$0xff]  ;;  %v131_v34 = vld [vmem:[#allocation5 + $0x68] sm:$0xff]  ;;  %v648_v35 = vpack.c.bf16 %v227_v31, %v226_v30  ;;  %v228_v36 = vld [vmem:[#allocation8 + $0x50] sm:$0xff] }
  0x88   :  { %609 = vmatprep.subr.bf16.mxu0 %v608_v8  ;;  %637 = vmatprep.subr.bf16.mxu1 %v636_v17  ;;  %v229_v37 = vld [vmem:[#allocation8 + $0x58] sm:$0xff]  ;;  %v624_v38 = vpack.c.bf16 %v131_v34, %v130_v33  ;;  %v132_v39 = vld [vmem:[#allocation5 + $0x70] sm:$0xff]  ;;  %v230_v42 = vld [vmem:[#allocation8 + $0x60] sm:$0xff] }
  0x89   :  { %v133_v40 = vld [vmem:[#allocation5 + $0x78] sm:$0xff]  ;;  %v652_v41 = vpack.c.bf16 %v229_v37, %v228_v36  ;;  %v231_v43 = vld [vmem:[#allocation8 + $0x68] sm:$0xff]  ;;  %v438_v7 = vld [vmem:[#allocation7] ss:$0 sm:$0xff] }
  0x8a   :  { %v628_v44 = vpack.c.bf16 %v133_v40, %v132_v39  ;;  %v656_v45 = vpack.c.bf16 %v231_v43, %v230_v42  ;;  %v117_v46 = vld [vmem:[#allocation2 + $0x8] sm:$0xff]  ;;  %v318_v50 = vld [vmem:[#allocation11] sm:$0xff]  ;;  %v319_v51 = vld [vmem:[#allocation11 + $0x8] sm:$0xff] }
  0x8b   :  { %611 = vmatpush3.bf16.msra.mxu0 %v608_v8  ;;  %639 = vmatpush3.bf16.msra.mxu1 %v636_v17  ;;  %v232_v47 = vld [vmem:[#allocation8 + $0x70] sm:$0xff]  ;;  %v233_v48 = vld [vmem:[#allocation8 + $0x78] sm:$0xff]  ;;  %v664_v53 = vpack.c.bf16 %v319_v51, %v318_v50  ;;  %v322_v56 = vld [vmem:[#allocation11 + $0x20] sm:$0xff] }
  0x8c   :  { %613 = vmatprep.subr.bf16.mxu0 %v612_v20  ;;  %641 = vmatprep.subr.bf16.mxu1 %v640_v23  ;;  %v660_v49 = vpack.c.bf16 %v233_v48, %v232_v47  ;;  %v320_v52 = vld [vmem:[#allocation11 + $0x10] sm:$0xff]  ;;  %v321_v54 = vld [vmem:[#allocation11 + $0x18] sm:$0xff]  ;;  %v323_v57 = vld [vmem:[#allocation11 + $0x28] sm:$0xff] }
  0x8d   :  { %v668_v55 = vpack.c.bf16 %v321_v54, %v320_v52  ;;  %v672_v58 = vpack.c.bf16 %v323_v57, %v322_v56  ;;  %v324_v59 = vld [vmem:[#allocation11 + $0x30] sm:$0xff]  ;;  %v325_v60 = vld [vmem:[#allocation11 + $0x38] sm:$0xff]  ;;  %v326_v62 = vld [vmem:[#allocation11 + $0x40] sm:$0xff] }
  0x8e   :  { %v676_v61 = vpack.c.bf16 %v325_v60, %v324_v59  ;;  %v327_v63 = vld [vmem:[#allocation11 + $0x48] sm:$0xff]  ;;  %v328_v1 = vld [vmem:[#allocation11 + $0x50] sm:$0xff]  ;;  %v329_v2 = vld [vmem:[#allocation11 + $0x58] sm:$0xff] }
  0x8f   :  { %615 = vmatpush3.bf16.msra.mxu0 %v612_v20  ;;  %643 = vmatpush3.bf16.msra.mxu1 %v640_v23  ;;  %v680_v0 = vpack.c.bf16 %v327_v63, %v326_v62  ;;  %v684_v3 = vpack.c.bf16 %v329_v2, %v328_v1  ;;  %v330_v4 = vld [vmem:[#allocation11 + $0x60] sm:$0xff]  ;;  %v331_v5 = vld [vmem:[#allocation11 + $0x68] sm:$0xff]  ;;  %v332_v14 = vld [vmem:[#allocation11 + $0x70] sm:$0xff] }
  0x90   :  { %617 = vmatprep.subr.bf16.mxu0 %v616_v26  ;;  %645 = vmatprep.subr.bf16.mxu1 %v644_v29  ;;  %v688_v6 = vpack.c.bf16 %v331_v5, %v330_v4  ;;  %v333_v15 = vld [vmem:[#allocation11 + $0x78] sm:$0xff]  ;;  %v440_v24 = vld [vmem:[#allocation13] ss:$0 sm:$0xff] }
  0x91   :  { %v692_v16 = vpack.c.bf16 %v333_v15, %v332_v14  ;;  %v439_v17 = vld [vmem:[#allocation10] ss:$0 sm:$0xff] }
  0x93   :  { %619 = vmatpush3.bf16.msra.mxu0 %v616_v26  ;;  %647 = vmatpush3.bf16.msra.mxu1 %v644_v29 }
  0x94   :  { %621 = vmatprep.subr.bf16.mxu0 %v620_v32  ;;  %649 = vmatprep.subr.bf16.mxu1 %v648_v35 }
  0x97   :  { %623 = vmatpush3.bf16.msra.mxu0 %v620_v32  ;;  %651 = vmatpush3.bf16.msra.mxu1 %v648_v35 }
  0x98   :  { %625 = vmatprep.subr.bf16.mxu0 %v624_v38  ;;  %653 = vmatprep.subr.bf16.mxu1 %v652_v41 }
  0x9b   :  { %627 = vmatpush3.bf16.msra.mxu0 %v624_v38  ;;  %655 = vmatpush3.bf16.msra.mxu1 %v652_v41 }
  0x9c   :  { %629 = vmatprep.subr.bf16.mxu0 %v628_v44  ;;  %657 = vmatprep.subr.bf16.mxu1 %v656_v45 }
  0x9f   :  { %631 = vmatpush3.bf16.msra.mxu0 %v628_v44  ;;  %659 = vmatpush3.bf16.msra.mxu1 %v656_v45 }
  0xa0   :  { %661 = vmatprep.subr.bf16.mxu1 %v660_v49  ;;  %665 = vmatprep.subr.bf16.mxu0 %v664_v53 }
  0xa2   :  { %528 = vmatmul.mubr.f32.vlgmr.msra.gmra.mrb[0].mxu0 %v117_v46 }
  0xa3   :  { %663 = vmatpush3.bf16.msra.mxu1 %v660_v49  ;;  %667 = vmatpush3.bf16.msra.mxu0 %v664_v53 }
  0xa4   :  { %669 = vmatprep.subr.bf16.mxu0 %v668_v55 }
  0xa7   :  { %671 = vmatpush3.bf16.msra.mxu0 %v668_v55 }
  0xa8   :  { %673 = vmatprep.subr.bf16.mxu0 %v672_v58 }
  0xab   :  { %675 = vmatpush3.bf16.msra.mxu0 %v672_v58 }
  0xac   :  { %677 = vmatprep.subr.bf16.mxu0 %v676_v61 }
  0xaf   :  { %679 = vmatpush3.bf16.msra.mxu0 %v676_v61 }
  0xb0   :  { %681 = vmatprep.subr.bf16.mxu0 %v680_v0 }
  0xb3   :  { %683 = vmatpush3.bf16.msra.mxu0 %v680_v0 }
  0xb4   :  { %685 = vmatprep.subr.bf16.mxu0 %v684_v3 }
  0xb7   :  { %687 = vmatpush3.bf16.msra.mxu0 %v684_v3 }
  0xb8   :  { %689 = vmatprep.subr.bf16.mxu0 %v688_v6 }
  0xbb   :  { %691 = vmatpush3.bf16.msra.mxu0 %v688_v6 }
  0xbc   :  { %693 = vmatprep.subr.bf16.mxu0 %v692_v16 }
  0xbf   :  { %695 = vmatpush3.bf16.msra.mxu0 %v692_v16 }
 0x175   :  { %v529_v8 = vpop.f32.mrb[0].mxu0 }
 0x176   :  { %v213_v9 = vadd.f32 %v529_v8, %v438_v7  ;;  %v207_v10 = vpop.f32.mrb[1].mxu0 }
 0x177   :  { %v208_v11 = vadd.f32 %v438_v7, %v207_v10 }
 0x178   :  { %v217_v13 = vmax.f32 %v213_v9, 0.0 }
 0x179   :  { %v216_v12 = vmax.f32 %v208_v11, 0.0 }
 0x17b   :  { %562 = vmatprep.mubr.f32.mxu1 %v216_v12 }
 0x17c   :  { %563 = vmatmul.mubr.f32.vlgmr.msra.gmra.mrb[0].mxu1 %v217_v13 }
 0x24f   :  { %v564_v18 = vpop.f32.mrb[0].mxu1 }
 0x250   :  { %v313_v19 = vadd.f32 %v564_v18, %v439_v17  ;;  %v307_v20 = vpop.f32.mrb[1].mxu1 }
 0x251   :  { %v308_v21 = vadd.f32 %v439_v17, %v307_v20 }
 0x252   :  { %v317_v23 = vmax.f32 %v313_v19, 0.0 }
 0x253   :  { %v316_v22 = vmax.f32 %v308_v21, 0.0 }
 0x255   :  { %597 = vmatprep.mubr.f32.mxu0 %v316_v22 }
 0x256   :  { %598 = vmatmul.mubr.f32.vlgmr.msra.gmra.mrb[2].mxu0 %v317_v23 }
 0x329   :  { %v599_v25 = vpop.f32.mrb[2].mxu0 }
 0x32a   :  { %v413_v26 = vadd.f32 %v599_v25, %v440_v24  ;;  %v407_v27 = vpop.f32.mrb[3].mxu0 }
 0x32b   :  { %v408_v28 = vadd.f32 %v440_v24, %v407_v27 }
 0x32c   :  { %417 = vst [vmem:[#allocation14 + $0x8] sm:$0xff] %v413_v26 }
 0x32d   :  { %416 = vst [vmem:[#allocation14] sm:$0xff] %v408_v28 }
 0x32e   :  { %871 = shalt.err (!%p868_p4)
}
 0x32f   :  { %s872_s19 = scalar_lea.hbm %s1074_s7, 256 }
 0x330   :  { %p873_p5 = scmp.ne.s32.totalorder %s1074_s7, %s872_s19  ;;  %p876_p6 = scmp.lt.u32.totalorder %s872_s19, %s1074_s7 }
 0x332   :  { %p878_p7 = pnand %p876_p6, %p873_p5 }
 0x334   :  { %881 = shalt.err (!%p878_p7)
}
 0x335   :  { %429 = dma.vmem_to_hbm [thread:$0]  %s424_s30, 256, %s1074_s7, [#allocation4], %s894_s13, %s894_s13, %s895_s14  }
 0x336   :  { %890 = dma.done.wait [#allocation4], 256  }
 0x337   :  { %891 = vsyncadd [#allocation4], 4294967040 }
 0x338   :  { %433 = vsyncpa [#allocation3], 1 }
 0x339   :  { %434 = vsyncpa [#allocation6], 1 }
 0x33a   :  { %435 = vsyncpa [#allocation9], 1 }
 0x33b   :  { %436 = vsyncpa [#allocation12], 1 }
 0x33c   :  { %437 = vsyncpa [#allocation4], 1 }

</bundles_post_ra>
